<compile_context>
chip_gen: v7x
topology: tpu7x:2x2x1
jax: 0.10.0
libtpu: 0.0.40
codegen_flags: <defaults>
</compile_context>

<pallas_src>
import jax
import jax.numpy as jnp
from jax import lax
from jax.experimental import pallas as pl
from jax.experimental.pallas import tpu as pltpu

_LANE = 128
_SUBLANE = 8


# ---------------------------------------------------------------------------
# Kernels
# ---------------------------------------------------------------------------
def _matmul_bias_kernel(x_ref, w_ref, b_ref, o_ref, acc_ref):
    # x_ref : (TM, TK)   activation tile
    # w_ref : (TN, TK)   weight tile, native [N, K] layout (transposed in-MXU)
    # b_ref : (1,  TN)   fp32 bias tile
    # o_ref : (TM, TN)   output tile (written once, at the last K step)
    # acc_ref: (TM, TN)  fp32 accumulator, resident across the K grid axis
    k = pl.program_id(2)

    @pl.when(k == 0)
    def _():
        acc_ref[...] = jnp.zeros_like(acc_ref)

    acc_ref[...] += lax.dot_general(
        x_ref[...], w_ref[...],
        dimension_numbers=(((1,), (1,)), ((), ())),
        preferred_element_type=jnp.float32,
    )

    @pl.when(k == pl.num_programs(2) - 1)
    def _():
        o_ref[...] = (acc_ref[...] + b_ref[...]).astype(o_ref.dtype)


def _matmul_kernel(x_ref, w_ref, o_ref, acc_ref):
    k = pl.program_id(2)

    @pl.when(k == 0)
    def _():
        acc_ref[...] = jnp.zeros_like(acc_ref)

    acc_ref[...] += lax.dot_general(
        x_ref[...], w_ref[...],
        dimension_numbers=(((1,), (1,)), ((), ())),
        preferred_element_type=jnp.float32,
    )

    @pl.when(k == pl.num_programs(2) - 1)
    def _():
        o_ref[...] = acc_ref[...].astype(o_ref.dtype)


# ---------------------------------------------------------------------------
# Wrapper helpers
# ---------------------------------------------------------------------------
def _round_up(x, m):
    return ((x + m - 1) // m) * m


def _choose_tile(dim, max_tile, granule):
    """Largest multiple of `granule` <= max_tile (and <= dim) dividing `dim`.

    `dim` is already a multiple of `granule`, so this always terminates
    (worst case: granule).  Avoids rounding a dimension up to the tile size.
    """
    t = min(max_tile, dim)
    t = max(granule, (t // granule) * granule)
    while dim % t:
        t -= granule
    return t


def _tpu_defaults():
    """Generation-aware (tm, tn, tk, vmem_limit_bytes); safe fallback otherwise."""
    try:
        kind = jax.devices()[0].device_kind.lower()
    except Exception:  # pragma: no cover - defensive
        kind = ""
    if "v6" in kind:
        # 128 MiB VMEM, 918 TF/s MXU: go wide on N/K, big scoped-VMEM budget.
        return 512, 2048, 2048, 96 * 1024 * 1024
    if "v5e" in kind or "v5 lite" in kind or "v5lite" in kind:
        # 128 MiB VMEM but MXU-bound early: moderate K tile, raise 16 MiB default.
        return 512, 1024, 512, 64 * 1024 * 1024
    # v7x (64 MiB VMEM/TC, 2 TCs) and unknown chips: conservative budget,
    # tiles small enough to keep >=2 parallel M/N blocks for both TCs.
    return 512, 1024, 1024, 44 * 1024 * 1024


# ---------------------------------------------------------------------------
# Public entry point (mirrors ColumnParallelLinear.forward at world_size == 1)
# ---------------------------------------------------------------------------
def column_parallel_linear(x, weight, bias=None, *, skip_bias_add=False,
                           tm=None, tn=None, tk=None, vmem_limit_bytes=None):
    """x: [..., input_size]; weight: [output_size, input_size]; bias: [output_size].

    Returns (output, output_bias) exactly like the PyTorch module.
    """
    *lead, K = x.shape
    N, K_w = weight.shape
    assert K == K_w, "weight/input size mismatch"
    M = 1
    for d in lead:
        M *= d

    d_tm, d_tn, d_tk, d_vmem = _tpu_defaults()
    tm = d_tm if tm is None else tm
    tn = d_tn if tn is None else tn
    tk = d_tk if tk is None else tk
    vmem_limit_bytes = d_vmem if vmem_limit_bytes is None else vmem_limit_bytes

    out_dtype = x.dtype
    x2 = x.reshape(M, K)

    # Minimal, conditional padding: only to sublane(8)/lane(128) alignment.
    # Zero-padding K is exact for the contraction; padded M rows / N cols are
    # sliced off afterwards. For real transformer dims no pad is emitted.
    M_pad = _round_up(M, _SUBLANE)
    K_pad = _round_up(K, _LANE)
    N_pad = _round_up(N, _LANE)

    if (M_pad, K_pad) != (M, K):
        x2 = jnp.pad(x2, ((0, M_pad - M), (0, K_pad - K)))
    w = weight  # consumed natively as [N, K]; no wrapper-side transpose pass
    if (N_pad, K_pad) != (N, K):
        w = jnp.pad(w, ((0, N_pad - N), (0, K_pad - K)))

    add_bias = (bias is not None) and (not skip_bias_add)
    if add_bias:
        # Keep bias at fp32 into the kernel (no bf16 double-rounding).
        b = bias.astype(jnp.float32).reshape(1, N)
        if N_pad != N:
            b = jnp.pad(b, ((0, 0), (0, N_pad - N)))

    # Tile sizes: divisors of the aligned dims; prefer 256-multiples for the
    # 2x256x256 MXU on v6e/v7x when the dims allow.
    TM = _choose_tile(M_pad, tm, _SUBLANE)
    kg = 256 if (K_pad % 256 == 0 and tk >= 256) else _LANE
    ng = 256 if (N_pad % 256 == 0 and tn >= 256) else _LANE
    TK = _choose_tile(K_pad, tk, kg)
    TN = _choose_tile(N_pad, tn, ng)

    grid = (M_pad // TM, N_pad // TN, K_pad // TK)

    x_spec = pl.BlockSpec((TM, TK), lambda i, j, k: (i, k))
    # Deepen weight buffering only in the memory-bound (small-M, multi-K-step)
    # regime, where a third buffer hides DMA bubbles at K-tile boundaries.
    if M_pad <= 1024 and grid[2] >= 2:
        w_spec = pl.BlockSpec((TN, TK), lambda i, j, k: (j, k),
                              pipeline_mode=pl.Buffered(3))
    else:
        w_spec = pl.BlockSpec((TN, TK), lambda i, j, k: (j, k))
    o_spec = pl.BlockSpec((TM, TN), lambda i, j, k: (i, j))

    in_specs = [x_spec, w_spec]
    operands = [x2, w]
    kernel = _matmul_kernel
    if add_bias:
        in_specs.append(pl.BlockSpec((1, TN), lambda i, j, k: (0, j)))
        operands.append(b)
        kernel = _matmul_bias_kernel

    itemsize = jnp.dtype(out_dtype).itemsize
    bytes_accessed = int(
        x2.size * jnp.dtype(x2.dtype).itemsize * (N_pad // TN)   # x re-read per N block
        + w.size * jnp.dtype(w.dtype).itemsize * (M_pad // TM)   # w re-read per M block
        + M_pad * N_pad * itemsize                                # output written once
        + (b.size * 4 if add_bias else 0)
    )
    cost = pl.CostEstimate(
        flops=2 * M_pad * N_pad * K_pad,
        transcendentals=0,
        bytes_accessed=bytes_accessed,
    )

    out = pl.pallas_call(
        kernel,
        out_shape=jax.ShapeDtypeStruct((M_pad, N_pad), out_dtype),
        grid_spec=pltpu.PrefetchScalarGridSpec(
            num_scalar_prefetch=0,
            grid=grid,
            in_specs=in_specs,
            out_specs=o_spec,
            scratch_shapes=[pltpu.VMEM((TM, TN), jnp.float32)],
        ),
        compiler_params=pltpu.CompilerParams(
            dimension_semantics=("parallel", "parallel", "arbitrary"),
            vmem_limit_bytes=vmem_limit_bytes,
        ),
        cost_estimate=cost,
    )(*operands)

    if (M_pad, N_pad) != (M, N):
        out = out[:M, :N]
    out = out.reshape(*lead, N)
    output_bias = bias if skip_bias_add else None
    return out, output_bias


# ---------------------------------------------------------------------------
# Pure-JAX reference (mirrors F.linear + the module's return convention)
# ---------------------------------------------------------------------------
def reference_linear(x, weight, bias=None, skip_bias_add=False):
    y = jnp.dot(x.astype(jnp.float32), weight.astype(jnp.float32).T)
    if (bias is not None) and (not skip_bias_add):
        y = y + bias.astype(jnp.float32)
    out = y.astype(x.dtype)
    out_bias = bias if skip_bias_add else None
    return out, out_bias


if __name__ == "__main__":
    key = jax.random.PRNGKey(0)
    batch, seq, input_size, output_size = 2, 8, 32, 64  # small, module-consistent

    k1, k2, k3 = jax.random.split(key, 3)
    x = (0.5 * jax.random.normal(k1, (batch, seq, input_size))).astype(jnp.bfloat16)
    weight = (0.1 * jax.random.normal(k2, (output_size, input_size))).astype(
        jnp.bfloat16
    )
    bias = (0.1 * jax.random.normal(k3, (output_size,))).astype(jnp.bfloat16)

    # 1) bias fused into the matmul epilogue
    out, out_bias = column_parallel_linear(x, weight, bias, skip_bias_add=False)
    out = jax.block_until_ready(out)
    ref, ref_bias = reference_linear(x, weight, bias, skip_bias_add=False)
    assert out.dtype == jnp.bfloat16
    assert out.shape == (batch, seq, output_size)
    assert out_bias is None and ref_bias is None
    assert jnp.allclose(
        out.astype(jnp.float32), ref.astype(jnp.float32), atol=2e-2, rtol=2e-2
    ), "mismatch vs reference (bias fused)"

    # 2) skip_bias_add: bias returned separately, bias-less kernel variant used
    out2, out_bias2 = column_parallel_linear(x, weight, bias, skip_bias_add=True)
    out2 = jax.block_until_ready(out2)
    ref2, _ = reference_linear(x, weight, bias, skip_bias_add=True)
    assert out_bias2 is bias
    assert jnp.allclose(
        out2.astype(jnp.float32), ref2.astype(jnp.float32), atol=2e-2, rtol=2e-2
    ), "mismatch vs reference (skip_bias_add)"

    # 3) bias=None path (module constructed with bias=False)
    out3, out_bias3 = column_parallel_linear(x, weight, None)
    out3 = jax.block_until_ready(out3)
    ref3, _ = reference_linear(x, weight, None)
    assert out_bias3 is None
    assert jnp.allclose(
        out3.astype(jnp.float32), ref3.astype(jnp.float32), atol=2e-2, rtol=2e-2
    ), "mismatch vs reference (no bias)"

    print("KERNEL_OK")
</pallas_src>

<mosaic_0001>
module attributes {stable_mosaic.version = 11 : i64} {
  func.func @_matmul_bias_kernel(%arg0: i32, %arg1: i32, %arg2: i32, %arg3: memref<16x128xbf16, #tpu.memory_space<vmem>>, %arg4: memref<128x128xbf16, #tpu.memory_space<vmem>>, %arg5: memref<1x128xf32, #tpu.memory_space<vmem>>, %arg6: memref<16x128xbf16, #tpu.memory_space<vmem>>, %arg7: memref<16x128xf32, #tpu.memory_space<vmem>>) attributes {dimension_semantics = [#tpu.dimension_semantics<parallel>, #tpu.dimension_semantics<parallel>, #tpu.dimension_semantics<arbitrary>], iteration_bounds = array<i64: 1, 1, 1>, scalar_prefetch = 0 : i64, scratch_operands = 1 : i64, tpu.core_type = #tpu.core_type<tc>, window_params = [{transform_indices = @transform_0, window_bounds = array<i64: 16, 128>}, {transform_indices = @transform_1, window_bounds = array<i64: 128, 128>}, {transform_indices = @transform_2, window_bounds = array<i64: 1, 128>}, {transform_indices = @transform_3, window_bounds = array<i64: 16, 128>}]} {
    %c0_i32 = arith.constant 0 : i32
    %0 = arith.cmpi eq, %arg2, %c0_i32 : i32
    %1 = arith.extui %0 : i1 to i32
    %c0_i32_0 = arith.constant 0 : i32
    %2 = arith.cmpi ne, %1, %c0_i32_0 : i32
    scf.if %2 {
      %cst_10 = arith.constant 0.000000e+00 : f32
      %12 = vector.broadcast %cst_10 : f32 to vector<16x128xf32>
      %c0_11 = arith.constant 0 : index
      %c0_12 = arith.constant 0 : index
      %13 = vector.load %arg7[%c0_11, %c0_12] : memref<16x128xf32, #tpu.memory_space<vmem>>, vector<16x128xf32>
      tpu.vector_store %arg7[%c0_11, %c0_12], %12 {strides = array<i32>} : memref<16x128xf32, #tpu.memory_space<vmem>>, vector<16x128xf32>,
    } else {
    }
    %c0 = arith.constant 0 : index
    %c0_1 = arith.constant 0 : index
    %3 = vector.load %arg7[%c0, %c0_1] : memref<16x128xf32, #tpu.memory_space<vmem>>, vector<16x128xf32>
    %c0_2 = arith.constant 0 : index
    %c0_3 = arith.constant 0 : index
    %4 = vector.load %arg3[%c0_2, %c0_3] : memref<16x128xbf16, #tpu.memory_space<vmem>>, vector<16x128xbf16>
    %c0_4 = arith.constant 0 : index
    %c0_5 = arith.constant 0 : index
    %5 = vector.load %arg4[%c0_4, %c0_5] : memref<128x128xbf16, #tpu.memory_space<vmem>>, vector<128x128xbf16>
    %cst = arith.constant dense<0.000000e+00> : vector<16x128xf32>
    %6 = tpu.matmul %4, %5, %cst {dimension_numbers = #tpu.dot_dimension_numbers<[1], [1], [0], [0], [0, 0, 1, 0], [], []>} : vector<16x128xbf16>, vector<128x128xbf16>, vector<16x128xf32> -> vector<16x128xf32>
    %7 = arith.addf %3, %6 : vector<16x128xf32>
    %c0_6 = arith.constant 0 : index
    %c0_7 = arith.constant 0 : index
    %8 = vector.load %arg7[%c0_6, %c0_7] : memref<16x128xf32, #tpu.memory_space<vmem>>, vector<16x128xf32>
    tpu.vector_store %arg7[%c0_6, %c0_7], %7 {strides = array<i32>} : memref<16x128xf32, #tpu.memory_space<vmem>>, vector<16x128xf32>,
    %c0_i32_8 = arith.constant 0 : i32
    %9 = arith.cmpi eq, %arg2, %c0_i32_8 : i32
    %10 = arith.extui %9 : i1 to i32
    %c0_i32_9 = arith.constant 0 : i32
    %11 = arith.cmpi ne, %10, %c0_i32_9 : i32
    scf.if %11 {
      %c0_10 = arith.constant 0 : index
      %c0_11 = arith.constant 0 : index
      %12 = vector.load %arg7[%c0_10, %c0_11] : memref<16x128xf32, #tpu.memory_space<vmem>>, vector<16x128xf32>
      %c0_12 = arith.constant 0 : index
      %c0_13 = arith.constant 0 : index
      %13 = vector.load %arg5[%c0_12, %c0_13] : memref<1x128xf32, #tpu.memory_space<vmem>>, vector<1x128xf32>
      %14 = vector.broadcast %13 : vector<1x128xf32> to vector<16x128xf32>
      %15 = arith.addf %12, %14 : vector<16x128xf32>
      %16 = arith.truncf %15 : vector<16x128xf32> to vector<16x128xbf16>
      %c0_14 = arith.constant 0 : index
      %c0_15 = arith.constant 0 : index
      %17 = vector.load %arg6[%c0_14, %c0_15] : memref<16x128xbf16, #tpu.memory_space<vmem>>, vector<16x128xbf16>
      tpu.vector_store %arg6[%c0_14, %c0_15], %16 {strides = array<i32>} : memref<16x128xbf16, #tpu.memory_space<vmem>>, vector<16x128xbf16>,
    } else {
    }
    return
  }
  func.func @transform_0(%arg0: i32, %arg1: i32, %arg2: i32) -> (i32, i32) {
    %c0_i32 = arith.constant 0 : i32
    return %arg0, %arg2 : i32, i32
  }
  func.func @transform_1(%arg0: i32, %arg1: i32, %arg2: i32) -> (i32, i32) {
    %c0_i32 = arith.constant 0 : i32
    return %arg1, %arg2 : i32, i32
  }
  func.func @transform_2(%arg0: i32, %arg1: i32, %arg2: i32) -> (i32, i32) {
    %c0_i32 = arith.constant 0 : i32
    %c0_i32_0 = arith.constant 0 : i32
    return %c0_i32, %arg1 : i32, i32
  }
  func.func @transform_3(%arg0: i32, %arg1: i32, %arg2: i32) -> (i32, i32) {
    %c0_i32 = arith.constant 0 : i32
    return %arg0, %arg1 : i32, i32
  }
}

</mosaic_0001>

<bundles_post_ra>
// kernel: tpu_custom_call.1
= control target key start
LH: loop header
LB: loop body
LE: loop exit
PB: predicated region body
PF: predicated region fallthrough
CT: control target
= control target key end

     0   :  { %8 = vsyncpa [#allocation4], 0  ;;  %s422_s0 = inlined_call_operand.hbm [shape: bf16[16,128], index: 0, kind: input, shape index: {}]   ;;  %s423_s1 = inlined_call_operand.hbm [shape: bf16[128,128], index: 1, kind: input, shape index: {}]   ;;  %s424_s2 = inlined_call_operand.vmem [shape: f32[1,128], index: 2, kind: input, shape index: {}]   ;;  %s425_s3 = inlined_call_operand.hbm [shape: bf16[16,128], index: 3, kind: output, shape index: {}]  }
   0x1   :  { %9 = vsyncpa [#allocation7], 0 }
   0x2   :  { %10 = vsyncpa [#allocation5], 0  ;;  %s347_s12 = smov [#allocation3]   ;;  %s275_s16 = scalar_lea.hbm %s422_s0, 128 }
   0x3   :  { %s16_s13 = sshll.u32 %s347_s12, 4  ;;  %p276_p0 = scmp.ne.s32.totalorder %s422_s0, %s275_s16  ;;  %s17_s13 = int_to_ptr.vmem [resolvable:$true] %s16_s13 }
   0x4   :  { %p279_p1 = scmp.lt.u32.totalorder %s275_s16, %s422_s0 }
   0x6   :  { %p281_p2 = pnand %p279_p1, %p276_p0 }
   0x8   :  { %284 = shalt.err (!%p281_p2)
}
   0x9   :  { %s285_s21 = scalar_lea.vmem %s17_s13, 128  ;;  %p290_p4 = scmp.lt.s32.totalorder %s17_s13, %s17_s13 }
   0xa   :  { %p286_p3 = scmp.ne.s32.totalorder %s17_s13, %s285_s21  ;;  %p291_p5 = scmp.lt.s32.totalorder %s285_s21, %s285_s21 }
   0xc   :  { %p292_p6 = por %p291_p5, %p290_p4 }
   0xe   :  { %p293_p7 = pnand %p292_p6, %p286_p3 }
  0x10   :  { %296 = shalt.err (!%p293_p7)
}
  0x11   :  { %s348_s22 = smov 64   ;;  %s349_s23 = smov 4  }
  0x12   :  { %22 = dma.hbm_to_vmem [thread:$0]  %s422_s0, 128, %s17_s13, [#allocation4], %s348_s22, %s348_s22, %s349_s23  }
  0x13   :  { %s350_s26 = smov [#allocation6]   ;;  %s297_s30 = scalar_lea.hbm %s423_s1, 1024 }
  0x14   :  { %s28_s27 = sshll.u32 %s350_s26, 4  ;;  %p298_p8 = scmp.ne.s32.totalorder %s423_s1, %s297_s30  ;;  %s29_s27 = int_to_ptr.vmem [resolvable:$true] %s28_s27 }
  0x15   :  { %p301_p9 = scmp.lt.u32.totalorder %s297_s30, %s423_s1 }
  0x17   :  { %p303_p10 = pnand %p301_p9, %p298_p8 }
  0x19   :  { %306 = shalt.err (!%p303_p10)
}
  0x1a   :  { %s307_s8 = scalar_lea.vmem %s29_s27, 1024  ;;  %p312_p12 = scmp.lt.s32.totalorder %s29_s27, %s29_s27 }
  0x1b   :  { %p308_p11 = scmp.ne.s32.totalorder %s29_s27, %s307_s8  ;;  %p313_p13 = scmp.lt.s32.totalorder %s307_s8, %s307_s8 }
  0x1d   :  { %p314_p0 = por %p313_p13, %p312_p12 }
  0x1f   :  { %p315_p1 = pnand %p314_p0, %p308_p11 }
  0x21   :  { %318 = shalt.err (!%p315_p1)
}
  0x22   :  { %34 = dma.hbm_to_vmem [thread:$0]  %s423_s1, 1024, %s29_s27, [#allocation7], %s348_s22, %s348_s22, %s349_s23  }
  0x23   :  { %341 = dma.done.wait [#allocation4], 128  }
  0x24   :  { %342 = vsyncadd [#allocation4], 4294967168 }
  0x25   :  { %343 = dma.done.wait [#allocation7], 1024  }
  0x26   :  { %344 = vsyncadd [#allocation7], 4294966272  ;;  %v351_v0 = vmov 0.0   ;;  %vm352_vm0 = vmmov 0   ;;  %v266_v1 = vld [vmem:[#allocation6] sm:$0xff]   ;;  %v267_v2 = vld [vmem:[#allocation6 + $0x8] sm:$0xff]  }
  0x27   :  { %239 = vmatprep.subr.bf16.mxu0 %v351_v0  ;;  %255 = vmatprep.mubr.msk.bf16.mxu0 %vm352_vm0, %v351_v0  ;;  %v268_v3 = vld [vmem:[#allocation6 + $0x10] sm:$0xff]   ;;  %v269_v4 = vld [vmem:[#allocation6 + $0x18] sm:$0xff]   ;;  %v270_v5 = vld [vmem:[#allocation6 + $0x20] sm:$0xff]   ;;  %s353_s11 = smov [#allocation8]  }
  0x28   :  { %240 = vmatpush3.bf16.xpose.msra.mxu0 %v266_v1  ;;  %v271_v6 = vld [vmem:[#allocation6 + $0x28] sm:$0xff]   ;;  %v272_v7 = vld [vmem:[#allocation6 + $0x30] sm:$0xff]   ;;  %v273_v8 = vld [vmem:[#allocation6 + $0x38] sm:$0xff]   ;;  %s198_s12 = sshll.u32 %s353_s11, 4  ;;  %s199_s12 = int_to_ptr.vmem [resolvable:$true] %s198_s12 }
  0x29   :  { %241 = vmatprep.subr.bf16.mxu0 %v351_v0  ;;  %v274_v9 = vld [vmem:[#allocation3] sm:$0xff]   ;;  %s319_s13 = scalar_lea.vmem %s199_s12, 128  ;;  %p324_p3 = scmp.lt.s32.totalorder %s199_s12, %s199_s12 }
  0x2a   :  { %v220_v11 = vld [vmem:[%s424_s2] ss:$0 sm:$0xff]  ;;  %p320_p2 = scmp.ne.s32.totalorder %s199_s12, %s319_s13  ;;  %p325_p4 = scmp.lt.s32.totalorder %s319_s13, %s319_s13 }
  0x2c   :  { %p326_p5 = por %p325_p4, %p324_p3 }
  0x2e   :  { %p327_p6 = pnand %p326_p5, %p320_p2 }
  0x30   :  { %242 = vmatpush3.bf16.xpose.msra.mxu0 %v267_v2 }
  0x31   :  { %243 = vmatprep.subr.bf16.mxu0 %v351_v0 }
  0x38   :  { %244 = vmatpush3.bf16.xpose.msra.mxu0 %v268_v3 }
  0x39   :  { %245 = vmatprep.subr.bf16.mxu0 %v351_v0 }
  0x40   :  { %246 = vmatpush3.bf16.xpose.msra.mxu0 %v269_v4 }
  0x41   :  { %247 = vmatprep.subr.bf16.mxu0 %v351_v0 }
  0x48   :  { %248 = vmatpush3.bf16.xpose.msra.mxu0 %v270_v5 }
  0x49   :  { %249 = vmatprep.subr.bf16.mxu0 %v351_v0 }
  0x50   :  { %250 = vmatpush3.bf16.xpose.msra.mxu0 %v271_v6 }
  0x51   :  { %251 = vmatprep.subr.bf16.mxu0 %v351_v0 }
  0x58   :  { %252 = vmatpush3.bf16.xpose.msra.mxu0 %v272_v7 }
  0x59   :  { %253 = vmatprep.subr.bf16.mxu0 %v351_v0 }
  0x60   :  { %254 = vmatpush3.bf16.xpose.msra.mxu0 %v273_v8 }
  0x67   :  { %256 = vmatmul.mubr.bf16.vlgmr.msra.gmra.mrb[0].mxu0 %v274_v9 }
 0x13a   :  { %v158_v10 = vpop.f32.mrb[0].mxu0 }
 0x13b   :  { %v257_v12 = vpop.f32.mrb[1].mxu0  ;;  %v181_v14 = vadd.f32 %v220_v11, %v158_v10 }
 0x13c   :  { %v161_v13 = vpop.f32.mrb[2].mxu0 }
 0x13d   :  { %v182_v15 = vadd.f32 %v220_v11, %v161_v13  ;;  %v258_v16 = vpop.f32.mrb[3].mxu0 }
 0x13f   :  { %v228_v17 = vpack.c.bf16 %v182_v15, %v181_v14 }
 0x141   :  { %229 = vst [vmem:[#allocation8] sm:$0xff] %v228_v17  }
 0x142   :  { %330 = shalt.err (!%p327_p6)
}
 0x143   :  { %s331_s2 = scalar_lea.hbm %s425_s3, 128 }
 0x144   :  { %p332_p7 = scmp.ne.s32.totalorder %s425_s3, %s331_s2  ;;  %p335_p8 = scmp.lt.u32.totalorder %s331_s2, %s425_s3 }
 0x146   :  { %p337_p9 = pnand %p335_p8, %p332_p7 }
 0x148   :  { %340 = shalt.err (!%p337_p9)
}
 0x149   :  { %204 = dma.vmem_to_hbm [thread:$0]  %s199_s12, 128, %s425_s3, [#allocation5], %s348_s22, %s348_s22, %s349_s23  }
 0x14a   :  { %345 = dma.done.wait [#allocation5], 128  }
 0x14b   :  { %346 = vsyncadd [#allocation5], 4294967168 }
 0x14c   :  { %208 = vsyncpa [#allocation4], 1 }
 0x14d   :  { %209 = vsyncpa [#allocation7], 1 }
 0x14e   :  { %210 = vsyncpa [#allocation5], 1 }

</bundles_post_ra>
